<compile_context>
chip_gen: v5e
topology: v5e:2x2
jax: 0.10.0
libtpu: 0.0.40
codegen_flags: <defaults>
</compile_context>

<pallas_src>
import jax
import jax.numpy as jnp
from jax.experimental import pallas as pl
from jax.experimental.pallas import tpu as pltpu


def _chomp_copy_kernel(x_ref, o_ref):
    # Identical (RT, TL) blocks for input and output -> pure block copy.
    # Edge blocks (partial along rows or L_out) are masked by Pallas.
    o_ref[...] = x_ref[...]


def _vmem_budget_bytes() -> int:
    """Per-step (input + output) byte budget: ~1/4 of physical VMEM, capped."""
    try:
        vmem = pltpu.get_tpu_info().vmem_capacity_bytes
    except Exception:
        vmem = 64 << 20  # conservative fallback (v7x per-TC physical)
    return max(4 << 20, min(16 << 20, vmem // 4))


def _tile_sizes(rows: int, l_out: int, itemsize: int, budget_bytes: int):
    """Pick (row_tile, lane_tile) for the flattened (rows, l_out) copy."""
    tile_bytes = budget_bytes // 2  # per operand (input tile + output tile)
    # Sublane quantum by dtype width (f32: 8, bf16: 16, int8/fp8: 32).
    sub = {4: 8, 2: 16, 1: 32}.get(itemsize, 8)

    l_padded = 128 * pl.cdiv(l_out, 128)
    cap = min(l_padded, 16384)

    def row_tile_for(tl: int) -> int:
        max_rows = max(sub, (tile_bytes // (tl * itemsize)) // sub * sub)
        return rows if rows <= max_rows else max_rows

    # Trace-time heuristic: total DMA bytes (incl. padded last-block read) at
    # ~1.2 TB/s plus ~0.35 us fixed overhead per grid step.  Larger lane tiles
    # amortize the overhead; tiles that divide L_out evenly avoid wasted reads
    # of the chomped tail.  Ties prefer the larger (more lane-dense) tile.
    _BW = 1.2e12
    _STEP_S = 0.35e-6
    best = None
    tl = 128
    while tl <= cap:
        rt = row_tile_for(tl)
        steps = pl.cdiv(l_out, tl) * pl.cdiv(rows, rt)
        bytes_moved = rows * itemsize * (tl * pl.cdiv(l_out, tl) + l_out)
        cost = bytes_moved / _BW + steps * _STEP_S
        if best is None or cost <= best[0]:
            best = (cost, tl, rt)
        tl += 128
    _, tl, rt = best
    return rt, tl


def chomp1d(x: jax.Array, chomp_size: int) -> jax.Array:
    """Drop the last `chomp_size` elements along the last axis of (N, C, L).

    Note: unlike the PyTorch slice, chomp_size == 0 and chomp_size >= L are
    rejected (the TCN always uses 0 < chomp_size < L).
    """
    n, c, l = x.shape
    assert 0 < chomp_size < l, "chomp_size must be in (0, L)"
    l_out = l - chomp_size
    rows = n * c

    x2 = x.reshape(rows, l)  # free, contiguous reshape

    itemsize = jnp.dtype(x.dtype).itemsize
    budget = _vmem_budget_bytes()
    rt, tl = _tile_sizes(rows, l_out, itemsize, budget)

    grid = (pl.cdiv(rows, rt), pl.cdiv(l_out, tl))
    block = (rt, tl)
    index_map = lambda ri, li: (ri, li)

    # Read covers the (lane-padded) prefix only, clamped to L; write is L_out.
    read_bytes = rows * min(tl * pl.cdiv(l_out, tl), l) * itemsize
    write_bytes = rows * l_out * itemsize

    y2 = pl.pallas_call(
        _chomp_copy_kernel,
        out_shape=jax.ShapeDtypeStruct((rows, l_out), x.dtype),
        grid_spec=pl.GridSpec(
            grid=grid,
            # TODO(synk): sweep pipeline_mode=pl.Buffered(3) on the input spec
            # (a pure copy has no compute to hide DMA jitter behind).
            in_specs=[pl.BlockSpec(block, index_map)],
            out_specs=pl.BlockSpec(block, index_map),
        ),
        compiler_params=pltpu.CompilerParams(
            dimension_semantics=("parallel", "parallel"),
            # Double-buffered in+out footprint is <= 2*budget (<= 32 MiB);
            # 48 MiB fits every generation's physical VMEM with headroom.
            vmem_limit_bytes=48 << 20,
        ),
        cost_estimate=pl.CostEstimate(
            flops=0, transcendentals=0, bytes_accessed=read_bytes + write_bytes
        ),
    )(x2)

    return y2.reshape(n, c, l_out)


if __name__ == "__main__":
    key = jax.random.PRNGKey(0)
    batch, channels, length = 2, 4, 16
    chomp_size = 3  # e.g. (kernel_size - 1) * dilation padding being chomped

    x = jax.random.normal(key, (batch, channels, length), dtype=jnp.float32)

    y = jax.block_until_ready(chomp1d(x, chomp_size))

    # Reference check against the pure-JAX equivalent of the PyTorch slice.
    ref = x[:, :, : length - chomp_size]
    assert y.shape == (batch, channels, length - chomp_size), y.shape
    assert y.dtype == x.dtype
    assert jnp.array_equal(y, ref), "mismatch vs reference slice"

    print("KERNEL_OK")
</pallas_src>

<mosaic_0001>
module attributes {stable_mosaic.version = 11 : i64} {
  func.func @_chomp_copy_kernel(%arg0: i32, %arg1: i32, %arg2: memref<8x128xf32, #tpu.memory_space<vmem>>, %arg3: memref<8x128xf32, #tpu.memory_space<vmem>>) attributes {dimension_semantics = [#tpu.dimension_semantics<parallel>, #tpu.dimension_semantics<parallel>], iteration_bounds = array<i64: 1, 1>, scalar_prefetch = 0 : i64, scratch_operands = 0 : i64, tpu.core_type = #tpu.core_type<tc>, window_params = [{transform_indices = @transform_0, window_bounds = array<i64: 8, 128>}, {transform_indices = @transform_1, window_bounds = array<i64: 8, 128>}]} {
    %c0 = arith.constant 0 : index
    %c0_0 = arith.constant 0 : index
    %0 = vector.load %arg2[%c0, %c0_0] : memref<8x128xf32, #tpu.memory_space<vmem>>, vector<8x128xf32>
    %c0_1 = arith.constant 0 : index
    %c0_2 = arith.constant 0 : index
    %1 = vector.load %arg3[%c0_1, %c0_2] : memref<8x128xf32, #tpu.memory_space<vmem>>, vector<8x128xf32>
    tpu.vector_store %arg3[%c0_1, %c0_2], %0 {strides = array<i32>} : memref<8x128xf32, #tpu.memory_space<vmem>>, vector<8x128xf32>,
    return
  }
  func.func @transform_0(%arg0: i32, %arg1: i32) -> (i32, i32) {
    %c0_i32 = arith.constant 0 : i32
    return %arg0, %arg1 : i32, i32
  }
  func.func @transform_1(%arg0: i32, %arg1: i32) -> (i32, i32) {
    %c0_i32 = arith.constant 0 : i32
    return %arg0, %arg1 : i32, i32
  }
}

</mosaic_0001>

<bundles_post_ra>
// kernel: tpu_custom_call.1
= control target key start
LH: loop header
LB: loop body
LE: loop exit
PB: predicated region body
PF: predicated region fallthrough
CT: control target
= control target key end

     0   :  { %6 = vsyncpa [#allocation3], 0  ;;  %s114_s0 = inlined_call_operand.hbm [shape: f32[8,16], index: 0, kind: input, shape index: {}]   ;;  %s115_s1 = inlined_call_operand.hbm [shape: f32[8,13], index: 1, kind: output, shape index: {}]  }
   0x1   :  { %7 = vsyncpa [#allocation4], 0  ;;  %s13_s8 = sshll.u32 %s114_s0, 4  ;;  %s96_s9 = smov [#allocation2]   ;;  %s14_s8 = int_to_ptr.hbm [resolvable:$true] %s13_s8 }
   0x2   :  { %s15_s10 = sshll.u32 %s96_s9, 4  ;;  %s16_s10 = int_to_ptr.vmem [resolvable:$true] %s15_s10 }
   0x3   :  { %18 = dma.hbm_to_vmem [thread:$0]  %s14_s8, 128, %s16_s10, [#allocation3]  }
   0x4   :  { %92 = dma.done.wait [#allocation3], 128  }
   0x5   :  { %93 = vsyncadd [#allocation3], 4294967168  ;;  %s97_s11 = smov [#allocation5]   ;;  %s32_s15 = sshll.u32 %s115_s1, 4  ;;  %v23_v0 = vld [vmem:[#allocation2] sm:$0xff]  ;;  %s33_s15 = int_to_ptr.hbm [resolvable:$true] %s32_s15 }
   0x6   :  { %s30_s12 = sshll.u32 %s97_s11, 4  ;;  %24 = vst [vmem:[#allocation5] sm:$0xff] %v23_v0  ;;  %s31_s12 = int_to_ptr.vmem [resolvable:$true] %s30_s12 }
   0x7   :  { %35 = dma.vmem_to_hbm [thread:$0]  %s31_s12, 128, %s33_s15, [#allocation4]  }
   0x8   :  { %94 = dma.done.wait [#allocation4], 128  }
   0x9   :  { %95 = vsyncadd [#allocation4], 4294967168 }
   0xa   :  { %40 = vsyncpa [#allocation3], 1 }
   0xb   :  { %41 = vsyncpa [#allocation4], 1 }

</bundles_post_ra>
